<compile_context>
chip_gen: v7x
topology: tpu7x:2x2x1
jax: 0.10.0
libtpu: 0.0.40
codegen_flags: <defaults>
</compile_context>

<pallas_src>
import jax
import jax.numpy as jnp
from jax import lax
from jax.experimental import pallas as pl
from jax.experimental.pallas import tpu as pltpu


# ---------------------------------------------------------------------------
# VMEM sizing helpers (generation aware)
# ---------------------------------------------------------------------------

def _vmem_capacity_bytes():
    """Physical VMEM of the current TPU generation; conservative fallback."""
    try:
        info = pltpu.get_tpu_info()
    except Exception:
        info = None
    if info is not None:
        for name in ("vmem_capacity_bytes", "vmem_bytes", "vmem_size_bytes"):
            v = getattr(info, name, None)
            if v:
                return int(v)
    return 64 * 1024 * 1024            # v7x per-core size: safe lower bound


def _vmem_config():
    cap = _vmem_capacity_bytes()
    vmem_limit = int(cap * 0.90)       # scoped limit handed to Mosaic
    block_budget = int(cap * 0.70)     # what pipelined blocks may use (headroom)
    return block_budget, vmem_limit


def _pick_thw(C, HW, itemsize, budget, n_big_blocks):
    """Lane (HW) tile so that `n_big_blocks` double-buffered (1, C, thw)
    blocks fit inside `budget` bytes."""
    max_thw = budget // (2 * n_big_blocks * C * itemsize)
    if HW <= max_thw:
        return HW                      # single full-extent tile (always legal)
    thw = (max_thw // 128) * 128       # lane tiles must be 128-aligned
    if thw < 128:
        raise ValueError(
            f"C={C} too large for VMEM budget {budget} bytes "
            f"(a 128-lane tile needs {2 * n_big_blocks * C * 128 * itemsize}).")
    return thw


def _fused_plan(C, HW, itemsize, budget):
    """Lane tile for the fused single-pass kernel, or None if the per-sample
    corrected slab does not fit the VMEM budget (use the two-kernel path)."""
    out_bytes = 2 * C * HW * itemsize  # resident output block, double-buffered
    tiny = 8 * C * 4                   # (1, C, 1) mean + distribution slabs
    min_in = 2 * C * 128 * itemsize    # smallest legal input tile, double-buffered
    if out_bytes + tiny + min_in > budget:
        return None
    max_in = (budget - out_bytes - tiny) // (2 * C * itemsize)
    if HW <= max_in:
        return HW
    if HW % 128 != 0:
        return None                    # cannot tile lanes cleanly; fall back
    thw = min((max_in // 128) * 128, HW)
    while thw >= 128 and HW % thw != 0:    # need thw | HW (tiles cover out slab)
        thw -= 128
    if thw < 128:
        return None
    return thw


# ---------------------------------------------------------------------------
# Fused single-pass kernel: read x once, write corrected once
# ---------------------------------------------------------------------------

def fused_correction(x, dist_c1, top_k, thw, vmem_limit):
    """x: (N, C, HW) logits; dist_c1: (N, C, 1) float32 class distribution.

    Returns (corrected (N, C, HW) in x.dtype, sd (N, C, 1) float32), where sd
    is the spatial mean of softmax(x, axis=1) and
    corrected = softmax(x) + (dist - sd) * (sd > kth_largest(sd)).
    """
    N, C, HW = x.shape
    assert HW % thw == 0
    n_hw = HW // thw
    inv_hw = 1.0 / float(HW)
    lane_aligned = (thw % 128 == 0)

    def kernel(x_ref, dist_ref, out_ref, mean_ref):
        hw = pl.program_id(1)

        @pl.when(hw == 0)
        def _():
            mean_ref[...] = jnp.zeros_like(mean_ref)

        # Channel softmax of this (1, C, thw) tile — exp computed exactly once.
        xv = x_ref[...].astype(jnp.float32)
        m = jnp.max(xv, axis=1, keepdims=True)
        e = jnp.exp(xv - m)
        s = jnp.sum(e, axis=1, keepdims=True)
        sm = e / s                                        # exact division

        mean_ref[...] += jnp.sum(sm, axis=2, keepdims=True)

        # Cache the softmax tile inside the VMEM-resident output slab.
        start = hw * thw
        if lane_aligned:
            start = pl.multiple_of(start, 128)
        out_ref[:, :, pl.ds(start, thw)] = sm.astype(out_ref.dtype)

        @pl.when(hw == n_hw - 1)
        def _():
            sd = mean_ref[...] * inv_hw                   # (1, C, 1) f32
            mean_ref[...] = sd

            # k-th largest channel mean (counting duplicates), torch.topk-style.
            ci = lax.broadcasted_iota(jnp.int32, sd.shape, 1)
            w = sd
            for _ in range(top_k - 1):                    # static unroll, top_k small
                t = jnp.max(w, axis=1, keepdims=True)
                first = jnp.min(jnp.where(w == t, ci, C), axis=1, keepdims=True)
                w = jnp.where(ci == first, -jnp.inf, w)
            thr = jnp.max(w, axis=1, keepdims=True)       # (1, 1, 1)

            mask = (sd > thr).astype(jnp.float32)         # strict `>` like reference
            res = (dist_ref[...].astype(jnp.float32) - sd) * mask    # (1, C, 1)

            # Re-walk the cached slab in VMEM: corrected = softmax + residual.
            out_ref[...] = (out_ref[...].astype(jnp.float32)
                            + res).astype(out_ref.dtype)

    return pl.pallas_call(
        kernel,
        out_shape=(jax.ShapeDtypeStruct((N, C, HW), x.dtype),
                   jax.ShapeDtypeStruct((N, C, 1), jnp.float32)),
        grid=(N, n_hw),
        in_specs=[pl.BlockSpec((1, C, thw), lambda n, h: (n, 0, h)),
                  # distribution stays resident: DMA'd once per sample
                  pl.BlockSpec((1, C, 1), lambda n, h: (n, 0, 0))],
        out_specs=(pl.BlockSpec((1, C, HW), lambda n, h: (n, 0, 0)),
                   pl.BlockSpec((1, C, 1), lambda n, h: (n, 0, 0))),
        compiler_params=pltpu.CompilerParams(
            dimension_semantics=("parallel", "arbitrary"),
            vmem_limit_bytes=vmem_limit),
    )(x, dist_c1)


# ---------------------------------------------------------------------------
# Fallback two-kernel path (per-sample slab too large for VMEM)
# ---------------------------------------------------------------------------

def softmax_spatial_mean(x, budget, vmem_limit):
    """x: (N, C, HW) logits.  Returns per-(N, C) spatial mean of the channel
    softmax, shape (N, C, 1), float32.  Softmax itself is NOT written to HBM."""
    N, C, HW = x.shape
    # Only one big (1, C, thw) block is double-buffered here -> 2x kernel-2 tile.
    thw = _pick_thw(C, HW, x.dtype.itemsize, budget, n_big_blocks=1)
    n_hw = pl.cdiv(HW, thw)
    inv_hw = 1.0 / float(HW)
    needs_mask = (HW % thw) != 0

    def kernel(x_ref, mean_ref):
        hw = pl.program_id(1)

        @pl.when(hw == 0)
        def _():
            mean_ref[...] = jnp.zeros_like(mean_ref)

        xv = x_ref[...].astype(jnp.float32)               # (1, C, thw)
        if needs_mask:                                    # emitted only if needed
            lane = lax.broadcasted_iota(jnp.int32, (1, 1, thw), 2)
            valid = (hw * thw + lane) < HW
            xv = jnp.where(valid, xv, 0.0)
        m = jnp.max(xv, axis=1, keepdims=True)
        e = jnp.exp(xv - m)
        s = jnp.sum(e, axis=1, keepdims=True)
        sm = e / s                                        # exact division
        if needs_mask:
            sm = jnp.where(valid, sm, 0.0)
        mean_ref[...] += jnp.sum(sm, axis=2, keepdims=True)

        @pl.when(hw == pl.num_programs(1) - 1)
        def _():
            mean_ref[...] *= inv_hw

    return pl.pallas_call(
        kernel,
        out_shape=jax.ShapeDtypeStruct((N, C, 1), jnp.float32),
        grid=(N, n_hw),
        in_specs=[pl.BlockSpec((1, C, thw), lambda n, h: (n, 0, h))],
        out_specs=pl.BlockSpec((1, C, 1), lambda n, h: (n, 0, 0)),
        compiler_params=pltpu.CompilerParams(
            dimension_semantics=("parallel", "arbitrary"),
            vmem_limit_bytes=vmem_limit),
    )(x)


def corrected_map(x, res_c1, budget, vmem_limit):
    """corrected = softmax(x, axis=1) + res (residual broadcast over HW).
    Pure streaming map: no spatial-mean accumulator (mean is sd + res
    analytically), no lane masking (softmax is per-lane independent and
    Pallas discards the padded part of edge output blocks)."""
    N, C, HW = x.shape
    thw = _pick_thw(C, HW, x.dtype.itemsize, budget, n_big_blocks=2)
    n_hw = pl.cdiv(HW, thw)

    def kernel(x_ref, res_ref, out_ref):
        xv = x_ref[...].astype(jnp.float32)               # (1, C, thw)
        m = jnp.max(xv, axis=1, keepdims=True)
        e = jnp.exp(xv - m)
        s = jnp.sum(e, axis=1, keepdims=True)
        out_ref[...] = (e / s
                        + res_ref[...].astype(jnp.float32)).astype(out_ref.dtype)

    return pl.pallas_call(
        kernel,
        out_shape=jax.ShapeDtypeStruct((N, C, HW), x.dtype),
        grid=(N, n_hw),
        in_specs=[pl.BlockSpec((1, C, thw), lambda n, h: (n, 0, h)),
                  pl.BlockSpec((1, C, 1), lambda n, h: (n, 0, 0))],
        out_specs=pl.BlockSpec((1, C, thw), lambda n, h: (n, 0, h)),
        compiler_params=pltpu.CompilerParams(
            dimension_semantics=("parallel", "arbitrary"),
            vmem_limit_bytes=vmem_limit),
    )(x, res_c1)


# ---------------------------------------------------------------------------
# Full forward pass (matches PyTorch DistributionCorrection.forward)
# ---------------------------------------------------------------------------

def distribution_correction(logits, distribution, top_k=5, force_two_pass=False):
    """logits: (N, C, H, W); distribution: (N, C, 1, 1)."""
    N, C, H, W = logits.shape
    HW = H * W
    x = logits.reshape(N, C, HW)
    dist = distribution.reshape(N, C).astype(jnp.float32)

    budget, vmem_limit = _vmem_config()
    thw = None if force_two_pass else _fused_plan(C, HW, x.dtype.itemsize, budget)

    if thw is not None:
        # Single HBM pass over the logits; corrected written once.
        corrected, sd_c1 = fused_correction(x, dist[:, :, None], top_k, thw,
                                            vmem_limit)
        sd = sd_c1[:, :, 0]                               # (N, C) f32
    else:
        sd = softmax_spatial_mean(x, budget, vmem_limit)[:, :, 0]
        corrected = None

    # ---- tiny per-sample top-k glue over C scalars (plain JAX) ----
    # TODO(synk): sorted top-k over C channel scalars has no natural Pallas
    # primitive; it is O(N*C) glue via jax.lax.top_k (matches torch.topk).
    tk = lax.top_k(sd, top_k)[0]                          # sorted desc, (N, k)
    thr = tk[:, top_k - 1:top_k]                          # k-th largest, (N, 1)
    top_k_mask = (sd > thr).astype(jnp.float32)           # strict `>` like reference

    k_softmax = sd * top_k_mask
    k_softmax = k_softmax / jnp.sum(k_softmax, axis=1, keepdims=True)
    k_softmax = lax.top_k(k_softmax, top_k)[0][:, :, None, None]

    dist_residual = (dist - sd) * top_k_mask              # (N, C) f32

    if corrected is None:
        corrected = corrected_map(x, dist_residual[:, :, None], budget, vmem_limit)
    corrected_distribution = corrected.reshape(N, C, H, W)

    # Spatial mean of `corrected` == sd + residual analytically (the residual
    # is constant over HW) — no second accumulator pass needed.
    cmean = sd + dist_residual

    k_softmax_alt = cmean * top_k_mask
    k_softmax_alt = k_softmax_alt / jnp.sum(k_softmax_alt, axis=1, keepdims=True)
    k_softmax_alt = lax.top_k(k_softmax_alt, top_k)[0][:, :, None, None]

    label = dist * top_k_mask
    label = label / (jnp.sum(label, axis=1, keepdims=True) + 1e-12)
    k_label = lax.top_k(label, top_k)[0][:, :, None, None]

    return corrected_distribution, k_label, k_softmax, k_softmax_alt


# ---------------------------------------------------------------------------
# Pure-JAX reference (transcription of the PyTorch module) + test harness
# ---------------------------------------------------------------------------

def _reference(logits, distribution, top_k):
    sm = jax.nn.softmax(logits.astype(jnp.float32), axis=1)
    sd = jnp.mean(sm, axis=(2, 3), keepdims=True)                   # (N,C,1,1)
    tk = lax.top_k(sd[:, :, 0, 0], top_k)[0]
    thr = tk[:, top_k - 1][:, None, None, None]
    mask = (sd > thr).astype(sd.dtype)
    k_softmax = sd * mask
    k_softmax = k_softmax / jnp.sum(k_softmax, axis=1, keepdims=True)
    k_softmax = lax.top_k(k_softmax[:, :, 0, 0], top_k)[0][:, :, None, None]
    res = (distribution.astype(jnp.float32) - sd) * mask
    corrected = sm + res
    cmean = jnp.mean(corrected, axis=(2, 3), keepdims=True)
    k_alt = cmean * mask
    k_alt = k_alt / jnp.sum(k_alt, axis=1, keepdims=True)
    k_alt = lax.top_k(k_alt[:, :, 0, 0], top_k)[0][:, :, None, None]
    label = distribution.astype(jnp.float32) * mask
    label = label / (jnp.sum(label, axis=1, keepdims=True) + 1e-12)
    k_label = lax.top_k(label[:, :, 0, 0], top_k)[0][:, :, None, None]
    return corrected, k_label, k_softmax, k_alt


if __name__ == "__main__":
    key = jax.random.PRNGKey(0)
    k1, k2 = jax.random.split(key)

    N, C, H, W = 2, 8, 16, 16            # C >= top_k
    TOP_K = 5

    logits = jax.random.normal(k1, (N, C, H, W), dtype=jnp.float32)
    d = jax.nn.softmax(jax.random.normal(k2, (N, C), dtype=jnp.float32), axis=1)
    distribution = d[:, :, None, None]

    ref = jax.block_until_ready(_reference(logits, distribution, TOP_K))

    def check(outs, tag):
        outs = jax.block_until_ready(outs)
        corrected, k_label, k_softmax, k_alt = outs
        assert corrected.shape == (N, C, H, W)
        assert k_label.shape == (N, TOP_K, 1, 1)
        assert k_softmax.shape == (N, TOP_K, 1, 1)
        assert k_alt.shape == (N, TOP_K, 1, 1)
        for got, want in zip(outs, ref):
            assert bool(jnp.all(jnp.isfinite(got))), tag
            err = float(jnp.max(jnp.abs(got.astype(jnp.float32) - want)))
            assert err < 1e-4, f"{tag}: max abs err {err}"

    # Fused single-pass path (per-sample slab fits VMEM at this shape).
    check(distribution_correction(logits, distribution, top_k=TOP_K), "fused")

    # Two-kernel fallback path, exercised explicitly for coverage.
    check(distribution_correction(logits, distribution, top_k=TOP_K,
                                  force_two_pass=True), "two_pass")

    print("KERNEL_OK")
</pallas_src>

<mosaic_0001>
module attributes {stable_mosaic.version = 11 : i64} {
  func.func @kernel(%arg0: i32, %arg1: i32, %arg2: memref<1x8x256xf32, #tpu.memory_space<vmem>>, %arg3: memref<1x8x1xf32, #tpu.memory_space<vmem>>, %arg4: memref<1x8x256xf32, #tpu.memory_space<vmem>>, %arg5: memref<1x8x1xf32, #tpu.memory_space<vmem>>) attributes {dimension_semantics = [#tpu.dimension_semantics<parallel>, #tpu.dimension_semantics<arbitrary>], iteration_bounds = array<i64: 2, 1>, scalar_prefetch = 0 : i64, scratch_operands = 0 : i64, tpu.core_type = #tpu.core_type<tc>, window_params = [{transform_indices = @transform_0, window_bounds = array<i64: 1, 8, 256>}, {transform_indices = @transform_1, window_bounds = array<i64: 1, 8, 1>}, {transform_indices = @transform_2, window_bounds = array<i64: 1, 8, 256>}, {transform_indices = @transform_3, window_bounds = array<i64: 1, 8, 1>}]} {
    %c0_i32 = arith.constant 0 : i32
    %0 = arith.cmpi eq, %arg1, %c0_i32 : i32
    %1 = arith.extui %0 : i1 to i32
    %c0_i32_0 = arith.constant 0 : i32
    %2 = arith.cmpi ne, %1, %c0_i32_0 : i32
    scf.if %2 {
      %cst_15 = arith.constant 0.000000e+00 : f32
      %25 = vector.broadcast %cst_15 : f32 to vector<1x8x1xf32>
      %c0_16 = arith.constant 0 : index
      %c0_17 = arith.constant 0 : index
      %c0_18 = arith.constant 0 : index
      %26 = vector.load %arg5[%c0_16, %c0_17, %c0_18] : memref<1x8x1xf32, #tpu.memory_space<vmem>>, vector<1x8x1xf32>
      tpu.vector_store %arg5[%c0_16, %c0_17, %c0_18], %25 {strides = array<i32>} : memref<1x8x1xf32, #tpu.memory_space<vmem>>, vector<1x8x1xf32>,
    } else {
    }
    %c0 = arith.constant 0 : index
    %c0_1 = arith.constant 0 : index
    %c0_2 = arith.constant 0 : index
    %3 = vector.load %arg2[%c0, %c0_1, %c0_2] : memref<1x8x256xf32, #tpu.memory_space<vmem>>, vector<1x8x256xf32>
    %cst = arith.constant dense<0xFF800000> : vector<1x256xf32>
    %4 = vector.multi_reduction <maximumf>, %3, %cst [1] : vector<1x8x256xf32> to vector<1x256xf32>
    %5 = vector.shape_cast %4 : vector<1x256xf32> to vector<1x1x256xf32>
    %6 = vector.broadcast %5 : vector<1x1x256xf32> to vector<1x8x256xf32>
    %7 = arith.subf %3, %6 : vector<1x8x256xf32>
    %8 = math.exp %7 : vector<1x8x256xf32>
    %cst_3 = arith.constant dense<0.000000e+00> : vector<1x256xf32>
    %9 = vector.multi_reduction <add>, %8, %cst_3 [1] : vector<1x8x256xf32> to vector<1x256xf32>
    %10 = vector.shape_cast %9 : vector<1x256xf32> to vector<1x1x256xf32>
    %11 = vector.broadcast %10 : vector<1x1x256xf32> to vector<1x8x256xf32>
    %12 = arith.divf %8, %11 : vector<1x8x256xf32>
    %c0_4 = arith.constant 0 : index
    %c0_5 = arith.constant 0 : index
    %c0_6 = arith.constant 0 : index
    %13 = vector.load %arg5[%c0_4, %c0_5, %c0_6] : memref<1x8x1xf32, #tpu.memory_space<vmem>>, vector<1x8x1xf32>
    %cst_7 = arith.constant dense<0.000000e+00> : vector<1x8xf32>
    %14 = vector.multi_reduction <add>, %12, %cst_7 [2] : vector<1x8x256xf32> to vector<1x8xf32>
    %15 = vector.shape_cast %14 : vector<1x8xf32> to vector<1x8x1xf32>
    %16 = arith.addf %13, %15 : vector<1x8x1xf32>
    %c0_8 = arith.constant 0 : index
    %c0_9 = arith.constant 0 : index
    %c0_10 = arith.constant 0 : index
    %17 = vector.load %arg5[%c0_8, %c0_9, %c0_10] : memref<1x8x1xf32, #tpu.memory_space<vmem>>, vector<1x8x1xf32>
    tpu.vector_store %arg5[%c0_8, %c0_9, %c0_10], %16 {strides = array<i32>} : memref<1x8x1xf32, #tpu.memory_space<vmem>>, vector<1x8x1xf32>,
    %c256_i32 = arith.constant 256 : i32
    %18 = arith.muli %arg1, %c256_i32 : i32
    %19 = tpu.assume_multiple %18, 128 : i32
    %c0_11 = arith.constant 0 : index
    %c0_12 = arith.constant 0 : index
    %20 = arith.index_cast %19 : i32 to index
    %21 = vector.load %arg4[%c0_11, %c0_12, %20] : memref<1x8x256xf32, #tpu.memory_space<vmem>>, vector<1x8x256xf32>
    tpu.vector_store %arg4[%c0_11, %c0_12, %20], %12 {strides = array<i32>} : memref<1x8x256xf32, #tpu.memory_space<vmem>>, vector<1x8x256xf32>,
    %c0_i32_13 = arith.constant 0 : i32
    %22 = arith.cmpi eq, %arg1, %c0_i32_13 : i32
    %23 = arith.extui %22 : i1 to i32
    %c0_i32_14 = arith.constant 0 : i32
    %24 = arith.cmpi ne, %23, %c0_i32_14 : i32
    scf.if %24 {
      %c0_15 = arith.constant 0 : index
      %c0_16 = arith.constant 0 : index
      %c0_17 = arith.constant 0 : index
      %25 = vector.load %arg5[%c0_15, %c0_16, %c0_17] : memref<1x8x1xf32, #tpu.memory_space<vmem>>, vector<1x8x1xf32>
      %cst_18 = arith.constant 3.906250e-03 : f32
      %26 = vector.broadcast %cst_18 : f32 to vector<1x8x1xf32>
      %27 = arith.mulf %25, %26 : vector<1x8x1xf32>
      %c0_19 = arith.constant 0 : index
      %c0_20 = arith.constant 0 : index
      %c0_21 = arith.constant 0 : index
      %28 = vector.load %arg5[%c0_19, %c0_20, %c0_21] : memref<1x8x1xf32, #tpu.memory_space<vmem>>, vector<1x8x1xf32>
      tpu.vector_store %arg5[%c0_19, %c0_20, %c0_21], %27 {strides = array<i32>} : memref<1x8x1xf32, #tpu.memory_space<vmem>>, vector<1x8x1xf32>,
      %29 = tpu.iota {dimensions = array<i32: 1>} : vector<1x8x1xi32>
      %cst_22 = arith.constant dense<0xFF800000> : vector<1x1xf32>
      %30 = vector.multi_reduction <maximumf>, %27, %cst_22 [1] : vector<1x8x1xf32> to vector<1x1xf32>
      %31 = vector.shape_cast %30 : vector<1x1xf32> to vector<1x1x1xf32>
      %32 = vector.broadcast %31 : vector<1x1x1xf32> to vector<1x8x1xf32>
      %33 = arith.cmpf oeq, %27, %32 : vector<1x8x1xf32>
      %c8_i32 = arith.constant 8 : i32
      %34 = vector.broadcast %c8_i32 : i32 to vector<1x8x1xi32>
      %35 = arith.select %33, %29, %34 : vector<1x8x1xi1>, vector<1x8x1xi32>
      %cst_23 = arith.constant dense<2147483647> : vector<1x1xi32>
      %36 = vector.multi_reduction <minsi>, %35, %cst_23 [1] : vector<1x8x1xi32> to vector<1x1xi32>
      %37 = vector.shape_cast %36 : vector<1x1xi32> to vector<1x1x1xi32>
      %38 = vector.broadcast %37 : vector<1x1x1xi32> to vector<1x8x1xi32>
      %39 = arith.cmpi eq, %29, %38 : vector<1x8x1xi32>
      %cst_24 = arith.constant 0xFF800000 : f32
      %40 = vector.broadcast %cst_24 : f32 to vector<1x8x1xf32>
      %41 = arith.select %39, %40, %27 : vector<1x8x1xi1>, vector<1x8x1xf32>
      %cst_25 = arith.constant dense<0xFF800000> : vector<1x1xf32>
      %42 = vector.multi_reduction <maximumf>, %41, %cst_25 [1] : vector<1x8x1xf32> to vector<1x1xf32>
      %43 = vector.shape_cast %42 : vector<1x1xf32> to vector<1x1x1xf32>
      %44 = vector.broadcast %43 : vector<1x1x1xf32> to vector<1x8x1xf32>
      %45 = arith.cmpf oeq, %41, %44 : vector<1x8x1xf32>
      %c8_i32_26 = arith.constant 8 : i32
      %46 = vector.broadcast %c8_i32_26 : i32 to vector<1x8x1xi32>
      %47 = arith.select %45, %29, %46 : vector<1x8x1xi1>, vector<1x8x1xi32>
      %cst_27 = arith.constant dense<2147483647> : vector<1x1xi32>
      %48 = vector.multi_reduction <minsi>, %47, %cst_27 [1] : vector<1x8x1xi32> to vector<1x1xi32>
      %49 = vector.shape_cast %48 : vector<1x1xi32> to vector<1x1x1xi32>
      %50 = vector.broadcast %49 : vector<1x1x1xi32> to vector<1x8x1xi32>
      %51 = arith.cmpi eq, %29, %50 : vector<1x8x1xi32>
      %cst_28 = arith.constant 0xFF800000 : f32
      %52 = vector.broadcast %cst_28 : f32 to vector<1x8x1xf32>
      %53 = arith.select %51, %52, %41 : vector<1x8x1xi1>, vector<1x8x1xf32>
      %cst_29 = arith.constant dense<0xFF800000> : vector<1x1xf32>
      %54 = vector.multi_reduction <maximumf>, %53, %cst_29 [1] : vector<1x8x1xf32> to vector<1x1xf32>
      %55 = vector.shape_cast %54 : vector<1x1xf32> to vector<1x1x1xf32>
      %56 = vector.broadcast %55 : vector<1x1x1xf32> to vector<1x8x1xf32>
      %57 = arith.cmpf oeq, %53, %56 : vector<1x8x1xf32>
      %c8_i32_30 = arith.constant 8 : i32
      %58 = vector.broadcast %c8_i32_30 : i32 to vector<1x8x1xi32>
      %59 = arith.select %57, %29, %58 : vector<1x8x1xi1>, vector<1x8x1xi32>
      %cst_31 = arith.constant dense<2147483647> : vector<1x1xi32>
      %60 = vector.multi_reduction <minsi>, %59, %cst_31 [1] : vector<1x8x1xi32> to vector<1x1xi32>
      %61 = vector.shape_cast %60 : vector<1x1xi32> to vector<1x1x1xi32>
      %62 = vector.broadcast %61 : vector<1x1x1xi32> to vector<1x8x1xi32>
      %63 = arith.cmpi eq, %29, %62 : vector<1x8x1xi32>
      %cst_32 = arith.constant 0xFF800000 : f32
      %64 = vector.broadcast %cst_32 : f32 to vector<1x8x1xf32>
      %65 = arith.select %63, %64, %53 : vector<1x8x1xi1>, vector<1x8x1xf32>
      %cst_33 = arith.constant dense<0xFF800000> : vector<1x1xf32>
      %66 = vector.multi_reduction <maximumf>, %65, %cst_33 [1] : vector<1x8x1xf32> to vector<1x1xf32>
      %67 = vector.shape_cast %66 : vector<1x1xf32> to vector<1x1x1xf32>
      %68 = vector.broadcast %67 : vector<1x1x1xf32> to vector<1x8x1xf32>
      %69 = arith.cmpf oeq, %65, %68 : vector<1x8x1xf32>
      %c8_i32_34 = arith.constant 8 : i32
      %70 = vector.broadcast %c8_i32_34 : i32 to vector<1x8x1xi32>
      %71 = arith.select %69, %29, %70 : vector<1x8x1xi1>, vector<1x8x1xi32>
      %cst_35 = arith.constant dense<2147483647> : vector<1x1xi32>
      %72 = vector.multi_reduction <minsi>, %71, %cst_35 [1] : vector<1x8x1xi32> to vector<1x1xi32>
      %73 = vector.shape_cast %72 : vector<1x1xi32> to vector<1x1x1xi32>
      %74 = vector.broadcast %73 : vector<1x1x1xi32> to vector<1x8x1xi32>
      %75 = arith.cmpi eq, %29, %74 : vector<1x8x1xi32>
      %cst_36 = arith.constant 0xFF800000 : f32
      %76 = vector.broadcast %cst_36 : f32 to vector<1x8x1xf32>
      %77 = arith.select %75, %76, %65 : vector<1x8x1xi1>, vector<1x8x1xf32>
      %cst_37 = arith.constant dense<0xFF800000> : vector<1x1xf32>
      %78 = vector.multi_reduction <maximumf>, %77, %cst_37 [1] : vector<1x8x1xf32> to vector<1x1xf32>
      %79 = vector.shape_cast %78 : vector<1x1xf32> to vector<1x1x1xf32>
      %80 = vector.broadcast %79 : vector<1x1x1xf32> to vector<1x8x1xf32>
      %81 = arith.cmpf ogt, %27, %80 : vector<1x8x1xf32>
      %82 = arith.extui %81 : vector<1x8x1xi1> to vector<1x8x1xi32>
      %83 = arith.sitofp %82 : vector<1x8x1xi32> to vector<1x8x1xf32>
      %c0_38 = arith.constant 0 : index
      %c0_39 = arith.constant 0 : index
      %c0_40 = arith.constant 0 : index
      %84 = vector.load %arg3[%c0_38, %c0_39, %c0_40] : memref<1x8x1xf32, #tpu.memory_space<vmem>>, vector<1x8x1xf32>
      %85 = arith.subf %84, %27 : vector<1x8x1xf32>
      %86 = arith.mulf %85, %83 : vector<1x8x1xf32>
      %c0_41 = arith.constant 0 : index
      %c0_42 = arith.constant 0 : index
      %c0_43 = arith.constant 0 : index
      %87 = vector.load %arg4[%c0_41, %c0_42, %c0_43] : memref<1x8x256xf32, #tpu.memory_space<vmem>>, vector<1x8x256xf32>
      %88 = vector.broadcast %86 : vector<1x8x1xf32> to vector<1x8x256xf32>
      %89 = arith.addf %87, %88 : vector<1x8x256xf32>
      %c0_44 = arith.constant 0 : index
      %c0_45 = arith.constant 0 : index
      %c0_46 = arith.constant 0 : index
      %90 = vector.load %arg4[%c0_44, %c0_45, %c0_46] : memref<1x8x256xf32, #tpu.memory_space<vmem>>, vector<1x8x256xf32>
      tpu.vector_store %arg4[%c0_44, %c0_45, %c0_46], %89 {strides = array<i32>} : memref<1x8x256xf32, #tpu.memory_space<vmem>>, vector<1x8x256xf32>,
    } else {
    }
    return
  }
  func.func @transform_0(%arg0: i32, %arg1: i32) -> (i32, i32, i32) {
    %c0_i32 = arith.constant 0 : i32
    %c0_i32_0 = arith.constant 0 : i32
    return %arg0, %c0_i32, %arg1 : i32, i32, i32
  }
  func.func @transform_1(%arg0: i32, %arg1: i32) -> (i32, i32, i32) {
    %c0_i32 = arith.constant 0 : i32
    %c0_i32_0 = arith.constant 0 : i32
    %c0_i32_1 = arith.constant 0 : i32
    return %arg0, %c0_i32, %c0_i32_0 : i32, i32, i32
  }
  func.func @transform_2(%arg0: i32, %arg1: i32) -> (i32, i32, i32) {
    %c0_i32 = arith.constant 0 : i32
    %c0_i32_0 = arith.constant 0 : i32
    %c0_i32_1 = arith.constant 0 : i32
    return %arg0, %c0_i32, %c0_i32_0 : i32, i32, i32
  }
  func.func @transform_3(%arg0: i32, %arg1: i32) -> (i32, i32, i32) {
    %c0_i32 = arith.constant 0 : i32
    %c0_i32_0 = arith.constant 0 : i32
    %c0_i32_1 = arith.constant 0 : i32
    return %arg0, %c0_i32, %c0_i32_0 : i32, i32, i32
  }
}

</mosaic_0001>

<bundles_post_ra>
// kernel: tpu_custom_call.1
= control target key start
LH: loop header
LB: loop body
LE: loop exit
PB: predicated region body
PF: predicated region fallthrough
CT: control target
= control target key end

     0   :  { %9 = vsyncpa [#allocation3], 0  ;;  %s1014_s0 = inlined_call_operand.hbm [shape: f32[2,8,256], index: 0, kind: input, shape index: {}]   ;;  %s1015_s1 = inlined_call_operand.vmem [shape: f32[2,8,1], index: 1, kind: input, shape index: {}]   ;;  %s1016_s2 = inlined_call_operand.hbm [shape: f32[2,8,256], index: 2, kind: output, shape index: {0}]   ;;  %s1017_s3 = inlined_call_operand.vmem [shape: f32[2,8,1], index: 3, kind: output, shape index: {1}]  }
   0x1   :  { %11 = vsyncpa [#allocation3 + $0x1], 0 }
   0x2   :  { %12 = vsyncpa [#allocation4], 0 }
   0x3   :  { %14 = vsyncpa [#allocation4 + $0x1], 0  ;;  %s776_s12 = smov 0   ;;  %s778_s13 = smov 0  }
   0x4   :  { %s780_s14 = smov 0   ;;  %s782_s15 = smov 0  }
   0x5   :  { %s784_s16 = smov 0   ;;  %s786_s17 = smov 0  }
   0x6 LB: > { %s545_s18 = sadd.s32 4294967295, %s750_s17   ;;  %s546_s19 = sadd.s32 4294967294, %s750_s17   ;;  %s750_s17 = sphi %s786_s17, %s20_s17   ;;  %s746_s16 = sphi %s784_s16, %s1033_s16   ;;  %s742_s15 = sphi %s782_s15, %s1032_s15   ;;  %s738_s14 = sphi %s780_s14, %s1031_s14   ;;  %s734_s13 = sphi %s778_s13, %s1030_s13   ;;  %s730_s12 = sphi %s776_s12, %s1029_s12  }
   0x7   : > { %s32_s20 = sadd.s32 1, %s746_s16  ;;  %s41_s21 = sadd.s32 1, %s738_s14 }
   0x8   : > { %p34_p0 = scmp.ge.s32.totalorder %s32_s20, 2  ;;  %p48_p1 = scmp.ne.s32.totalorder %s738_s14, %s734_s13 }
   0x9   : > { %p49_p2 = scmp.eq.s32.totalorder %s750_s17, 0  ;;  %p54_p3 = scmp.ne.s32.totalorder %s734_s13, %s730_s12 }
   0xa   : > { %s1035_s20 = smov (%p34_p0, %s32_s20), 0  ;;  %p55_p5 = scmp.eq.s32.totalorder %s545_s18, 0 }
   0xb   : > { %p817_p4 = por %p49_p2, %p48_p1  ;;  %s36_s23 = ssub.s32 %s746_s16, %s1035_s20 }
   0xc   : > { %p104_p6 = scmp.eq.s32.totalorder %s545_s18, 1  ;;  %p39_p7 = scmp.eq.s32.totalorder %s36_s23, 0 }
   0xd   : > { %p823_p8 = por %p55_p5, %p54_p3  ;;  %p110_p10 = scmp.eq.s32.totalorder %s546_s19, 1 }
   0xe   : > { %p827_p9 = por %p104_p6, %p48_p1  ;;  %p577_p13 = scmp.lt.s32.totalorder %s750_s17, 2 }
   0xf   : > { %s832_s26 = scalar_select %p39_p7, %s738_s14, %s41_s21  }
  0x10   : > { %s1021_s25 = scalar_select %p827_p9, 1, 0 }
  0x11   : > { %p834_p11 = por %p110_p10, %p54_p3  ;;  %s156_s28 = sand.u32 1, %s738_s14  }
  0x12   : > { %s549_s29 = sshll.u32 %s156_s28, 4  ;;  %s563_s30 = sshll.u32 %s746_s16, 8 }
  0x13   : > { %s1022_s27 = scalar_select %p834_p11, 1, 0 }
  0x14   : > { %s845_s6 = scalar_lea.hbm %s1014_s0, %s563_s30  ;;  %s160_s7 = scalar_lea.vmem [#allocation2], %s549_s29 }
  0x15   : > { %s170_s8 = sshll.u32 %s160_s7, 4  ;;  %p851_p0 = pnand %p577_p13, %p817_p4  ;;  %s847_s8 = int_to_ptr.vmem [resolvable:$true] %s170_s8 }
  0x16   : > { %s157_s10 = scalar_lea.sflag [#allocation3], %s156_s28  ;;  %s638_s11 = scalar_lea.hbm %s845_s6, 256 }
  0x17   : > { %p639_p3 = scmp.ne.s32.totalorder %s845_s6, %s638_s11  ;;  %p640_p5 = pneg %p851_p0 }
  0x18   : > { %s643_s21 = scalar_lea.hbm %s1014_s0, 512  ;;  %p644_p4 = scmp.lt.u32.totalorder %s845_s6, %s1014_s0 }
  0x19   : > { %p641_p6 = pnand %p640_p5, %p639_p3  ;;  %p645_p10 = scmp.lt.u32.totalorder %s643_s21, %s638_s11 }
  0x1a   : > { %p647_p12 = scmp.lt.u32.totalorder %s638_s11, %s845_s6 }
  0x1b   : > { %p642_p7 = pneg %p641_p6  ;;  %p646_p13 = por %p645_p10, %p644_p4 }
  0x1d   : > { %p648_p1 = por %p647_p12, %p646_p13 }
  0x1f   : > { %p649_p2 = pnand %p648_p1, %p642_p7 }
  0x21   : > { %652 = shalt.err (!%p649_p2)
}
  0x22   : > { %s653_s28 = scalar_lea.vmem %s847_s8, 256  ;;  %s752_s29 = smov [#allocation2]  }
  0x23   : > { %p654_p3 = scmp.ne.s32.totalorder %s847_s8, %s653_s28  ;;  %s658_s30 = sshll.u32 %s752_s29, 4  ;;  %s659_s30 = int_to_ptr.vmem [resolvable:$false] %s658_s30 }
  0x24   : > { %s660_s4 = scalar_lea.vmem %s659_s30, 512  ;;  %p661_p9 = scmp.lt.s32.totalorder %s847_s8, %s659_s30 }
  0x25   : > { %p656_p6 = pnand %p654_p3, %p640_p5  ;;  %p662_p4 = scmp.lt.s32.totalorder %s660_s4, %s653_s28 }
  0x27   : > { %p657_p11 = pneg %p656_p6  ;;  %p663_p10 = por %p662_p4, %p661_p9 }
  0x29   : > { %p664_p12 = pnand %p663_p10, %p657_p11 }
  0x2b   : > { %667 = shalt.err (!%p664_p12)
}
  0x2c   : > { %572 = dma.hbm_to_vmem [thread:$0]  (!%p851_p0), %s845_s6, 256, %s847_s8, %s157_s10  }
  0x2d   : > { %p1024_p1 = scmp.lt.s32.totalorder %s750_s17, 3  ;;  %p1025_p2 = scmp.ge.s32.totalorder %s750_s17, 1 }
  0x2f   : > { %p183_p5 = pnand %p1025_p2, %p1024_p1 }
  0x30   : > { %s887_s5 = sand.u32 (!%p183_p5), 1, %s734_s13  }
  0x31   : > { %186 = sbr.rel (%p183_p5) target bundleno = 548 (0x224), region = 28  ;;  %s553_s7 = sshll.u32 (!%p183_p5), %s887_s5, 4 }
  0x32   : > { %s189_s11 = scalar_lea.sflag (!%p183_p5), [#allocation3], %s887_s5  ;;  %s192_s9 = scalar_lea.vmem (!%p183_p5), [#allocation2], %s553_s7 }
  0x38   : > { %721 = dma.done.wait (%p823_p8), %s189_s11, 256  }
  0x39   : > { %723 = vsyncadd (%p823_p8), %s189_s11, 4294967040  ;;  %p224_p9 = scmp.lt.s32.totalorder %s742_s15, 1  ;;  %vm236_vm0 = vcmask 7168   ;;  %v753_v0 = vmov 0.0   ;;  %v238_v1 = vld [vmem:[%s192_s9] sm:$0xff]  ;;  %v239_v2 = vld [vmem:[%s192_s9 + $0x8] sm:$0xff]  ;;  %v294_v48 = vlaneseq }
  0x3a   : > { %v240_v3 = vrot.slane %v238_v1, 4  ;;  %v246_v4 = vrot.slane %v239_v2, 4  ;;  %v754_v38 = vmov 0   ;;  %s564_s23 = sshll.u32 %s742_s15, 8  ;;  %s216_s28 = scalar_lea.vmem [#allocation5], %s553_s7 }
  0x3b   : > { %s899_s6 = scalar_select %p224_p9, %s742_s15, 1  ;;  %629 = vset.pattern.permute.xlu0 %v754_v38  ;;  %v929_v51 = vshrl.u32 %v294_v48, 7 }
  0x3c   : > { %v241_v5 = vmax.f32 %v238_v1, %v240_v3  ;;  %v247_v6 = vmax.f32 %v239_v2, %v246_v4  ;;  %s423_s29 = sshll.u32 %s216_s28, 4  ;;  %s965_s11 = scalar_lea.hbm %s1016_s2, %s564_s23  ;;  %s967_s29 = int_to_ptr.vmem [resolvable:$true] %s423_s29 }
  0x3d   : > { %s555_s8 = sshll.u32 %s899_s6, 3  ;;  %s405_s15 = scalar_lea.sflag [#allocation4], %s887_s5 }
  0x3e   : > { %s907_s19 = scalar_lea.vmem %s1017_s3, %s555_s8  ;;  %v242_v7 = vrot.slane %v241_v5, 2  ;;  %v248_v8 = vrot.slane %v247_v6, 2  ;;  %s227_s22 = scalar_lea.vmem %s1015_s1, %s555_s8 }
  0x3f   : > { %237 = vst.msk [vmem:[%s907_s19] sm:$0xff] %vm236_vm0, %v753_v0  ;;  %s668_s7 = scalar_lea.vmem %s967_s29, 256  ;;  %p1026_p11 = scmp.ne.s32.totalorder %s1021_s25, 0 }
  0x40   : > { %v243_v9 = vmax.f32 %v241_v5, %v242_v7  ;;  %v249_v10 = vmax.f32 %v247_v6, %v248_v8  ;;  %p669_p8 = scmp.ne.s32.totalorder %s967_s29, %s668_s7  ;;  %s755_s9 = smov [#allocation5]  }
  0x41   : > { %s672_s6 = sshll.u32 %s755_s9, 4  ;;  %s673_s6 = int_to_ptr.vmem [resolvable:$false] %s672_s6 }
  0x42   : > { %v244_v11 = vrot.slane %v243_v9, 1  ;;  %v250_v12 = vrot.slane %v249_v10, 1  ;;  %p670_p0 = pnand %p669_p8, %p1026_p11  ;;  %s674_s8 = scalar_lea.vmem %s673_s6, 512 }
  0x43   : > { %p675_p13 = scmp.lt.s32.totalorder %s967_s29, %s673_s6  ;;  %p676_p3 = scmp.lt.s32.totalorder %s674_s8, %s668_s7 }
  0x44   : > { %v245_v13 = vmax.f32 %v243_v9, %v244_v11  ;;  %v251_v14 = vmax.f32 %v249_v10, %v250_v12  ;;  %p671_p7 = pneg %p670_p0 }
  0x45   : > { %p677_p6 = por %p676_p3, %p675_p13 }
  0x46   : > { %v252_v15 = vsub.f32 %v238_v1, %v245_v13  ;;  %v253_v16 = vsub.f32 %v239_v2, %v251_v14  ;;  %v274_v39 = vld [vmem:[%s907_s19] sm:$0xff] }
  0x47   : > { %p678_p4 = pnand %p677_p6, %p671_p7 }
  0x48   : > { %v254_v17 = vmul.f32 1.442695, %v252_v15  ;;  %v256_v18 = vmul.f32 1.442695, %v253_v16 }
  0x4a   : > { %630 = vpow2.f32 %v254_v17 }
  0x4b   : > { %632 = vpow2.f32 %v256_v18 }
  0x54   : > { %v631_v19 = vpop.eup %630 }
  0x55   : > { %v633_v20 = vpop.eup %632  ;;  %v258_v21 = vrot.slane %v631_v19, 4 }
  0x56   : > { %v264_v22 = vrot.slane %v633_v20, 4 }
  0x57   : > { %v259_v23 = vadd.f32 %v631_v19, %v258_v21 }
  0x58   : > { %v265_v24 = vadd.f32 %v633_v20, %v264_v22 }
  0x59   : > { %v260_v25 = vrot.slane %v259_v23, 2 }
  0x5a   : > { %v266_v26 = vrot.slane %v265_v24, 2 }
  0x5b   : > { %v261_v27 = vadd.f32 %v260_v25, %v259_v23 }
  0x5c   : > { %v267_v28 = vadd.f32 %v266_v26, %v265_v24 }
  0x5d   : > { %v262_v29 = vrot.slane %v261_v27, 1 }
  0x5e   : > { %v268_v30 = vrot.slane %v267_v28, 1 }
  0x5f   : > { %v263_v31 = vadd.f32 %v262_v29, %v261_v27 }
  0x60   : > { %v269_v32 = vadd.f32 %v268_v30, %v267_v28 }
  0x61   : > { %634 = vrcp.f32 %v263_v31 }
  0x62   : > { %636 = vrcp.f32 %v269_v32 }
  0x6b   : > { %v635_v33 = vpop.eup %634 }
  0x6c   : > { %v637_v34 = vpop.eup %636  ;;  %v912_v35 = vmul.f32 %v635_v33, %v631_v19 }
  0x6d   : > { %v914_v36 = vmul.f32 %v637_v34, %v633_v20 }
  0x6f   : > { %v275_v37 = vadd.f32 %v914_v36, %v912_v35 }
  0x71   : > { %276 = vadd.xlane.f32.xlu0 %v275_v37 }
  0xfe   : > { %v277_v40 = vpop.xlane.xlu0 %276 }
  0xff   : > { %v278_v41 = vadd.f32 %v277_v40, %v274_v39 }
 0x101   : > { %280 = vst.msk [vmem:[%s907_s19] sm:$0xff] %vm236_vm0, %v278_v41 }
 0x108   : > { %v291_v42 = vld [vmem:[%s907_s19] sm:$0xff] }
 0x109   : > { %v922_v43 = vmul.f32 0.00390625, %v291_v42 }
 0x10b   : > { %293 = vst.msk [vmem:[%s907_s19] sm:$0xff] %vm236_vm0, %v922_v43  ;;  %v296_v44 = vsel %vm236_vm0, %v922_v43, -inf }
 0x10c   : > { %v297_v45 = vrot.slane %v296_v44, 4 }
 0x10e   : > { %v298_v46 = vmax.f32 %v296_v44, %v297_v45 }
 0x110   : > { %v299_v47 = vrot.slane %v298_v46, 2 }
 0x112   : > { %v300_v49 = vmax.f32 %v298_v46, %v299_v47 }
 0x114   : > { %v301_v50 = vrot.slane %v300_v49, 1 }
 0x116   : > { %v302_v52 = vmax.f32 %v300_v49, %v301_v50 }
 0x118   : > { %vm303_vm1 = vcmp.eq.f32.partialorder %v922_v43, %v302_v52 }
 0x119   : > { %v304_v53 = vsel %vm303_vm1, %v929_v51, 8 }
 0x11a   : > { %v305_v54 = vsel %vm236_vm0, %v304_v53, 2147483647 }
 0x11b   : > { %v306_v55 = vrot.slane %v305_v54, 4 }
 0x11d   : > { %vm307_vm2 = vcmp.lt.s32.totalorder %v305_v54, %v306_v55 }
 0x11e   : > { %v308_v56 = vsel %vm307_vm2, %v305_v54, %v306_v55 }
 0x11f   : > { %v309_v57 = vrot.slane %v308_v56, 2 }
 0x121   : > { %vm310_vm3 = vcmp.lt.s32.totalorder %v308_v56, %v309_v57 }
 0x122   : > { %v311_v58 = vsel %vm310_vm3, %v308_v56, %v309_v57  ;;  %v390_v57 = vld [vmem:[%s227_s22] sm:$0xff] }
 0x123   : > { %v312_v59 = vrot.slane %v311_v58, 1 }
 0x125   : > { %vm313_vm4 = vcmp.lt.s32.totalorder %v311_v58, %v312_v59 }
 0x126   : > { %v314_v60 = vsel %vm313_vm4, %v311_v58, %v312_v59 }
 0x127   : > { %vm315_vm5 = vcmp.eq.s32.totalorder %v929_v51, %v314_v60 }
 0x128   : > { %v316_v61 = vsel %vm315_vm5, -inf, %v922_v43 }
 0x129   : > { %v317_v62 = vsel %vm236_vm0, %v316_v61, -inf }
 0x12a   : > { %v318_v63 = vrot.slane %v317_v62, 4 }
 0x12c   : > { %v319_v1 = vmax.f32 %v317_v62, %v318_v63 }
 0x12e   : > { %v320_v2 = vrot.slane %v319_v1, 2 }
 0x130   : > { %v321_v3 = vmax.f32 %v319_v1, %v320_v2 }
 0x132   : > { %v322_v4 = vrot.slane %v321_v3, 1 }
 0x134   : > { %v323_v5 = vmax.f32 %v321_v3, %v322_v4 }
 0x136   : > { %vm324_vm6 = vcmp.eq.f32.partialorder %v316_v61, %v323_v5 }
 0x137   : > { %v325_v6 = vsel %vm324_vm6, %v929_v51, 8 }
 0x138   : > { %v326_v7 = vsel %vm236_vm0, %v325_v6, 2147483647 }
 0x139   : > { %v327_v8 = vrot.slane %v326_v7, 4 }
 0x13b   : > { %vm328_vm7 = vcmp.lt.s32.totalorder %v326_v7, %v327_v8 }
 0x13c   : > { %v329_v9 = vsel %vm328_vm7, %v326_v7, %v327_v8 }
 0x13d   : > { %v330_v10 = vrot.slane %v329_v9, 2 }
 0x13f   : > { %vm331_vm8 = vcmp.lt.s32.totalorder %v329_v9, %v330_v10 }
 0x140   : > { %v332_v11 = vsel %vm331_vm8, %v329_v9, %v330_v10 }
 0x141   : > { %v333_v12 = vrot.slane %v332_v11, 1 }
 0x143   : > { %vm334_vm9 = vcmp.lt.s32.totalorder %v332_v11, %v333_v12 }
 0x144   : > { %v335_v13 = vsel %vm334_vm9, %v332_v11, %v333_v12 }
 0x145   : > { %vm336_vm10 = vcmp.eq.s32.totalorder %v929_v51, %v335_v13 }
 0x146   : > { %v337_v14 = vsel %vm336_vm10, -inf, %v316_v61 }
 0x147   : > { %v338_v15 = vsel %vm236_vm0, %v337_v14, -inf }
 0x148   : > { %v339_v16 = vrot.slane %v338_v15, 4 }
 0x14a   : > { %v340_v17 = vmax.f32 %v338_v15, %v339_v16 }
 0x14c   : > { %v341_v18 = vrot.slane %v340_v17, 2 }
 0x14e   : > { %v342_v19 = vmax.f32 %v340_v17, %v341_v18 }
 0x150   : > { %v343_v20 = vrot.slane %v342_v19, 1 }
 0x152   : > { %v344_v21 = vmax.f32 %v342_v19, %v343_v20 }
 0x154   : > { %vm345_vm11 = vcmp.eq.f32.partialorder %v337_v14, %v344_v21 }
 0x155   : > { %v346_v22 = vsel %vm345_vm11, %v929_v51, 8 }
 0x156   : > { %v347_v23 = vsel %vm236_vm0, %v346_v22, 2147483647 }
 0x157   : > { %v348_v24 = vrot.slane %v347_v23, 4 }
 0x159   : > { %vm349_vm12 = vcmp.lt.s32.totalorder %v347_v23, %v348_v24 }
 0x15a   : > { %v350_v25 = vsel %vm349_vm12, %v347_v23, %v348_v24 }
 0x15b   : > { %v351_v26 = vrot.slane %v350_v25, 2 }
 0x15d   : > { %vm352_vm13 = vcmp.lt.s32.totalorder %v350_v25, %v351_v26 }
 0x15e   : > { %v353_v27 = vsel %vm352_vm13, %v350_v25, %v351_v26 }
 0x15f   : > { %v354_v28 = vrot.slane %v353_v27, 1 }
 0x161   : > { %vm355_vm14 = vcmp.lt.s32.totalorder %v353_v27, %v354_v28 }
 0x162   : > { %v356_v29 = vsel %vm355_vm14, %v353_v27, %v354_v28 }
 0x163   : > { %vm357_vm15 = vcmp.eq.s32.totalorder %v929_v51, %v356_v29 }
 0x164   : > { %v358_v30 = vsel %vm357_vm15, -inf, %v337_v14 }
 0x165   : > { %v359_v31 = vsel %vm236_vm0, %v358_v30, -inf }
 0x166   : > { %v360_v32 = vrot.slane %v359_v31, 4 }
 0x168   : > { %v361_v33 = vmax.f32 %v359_v31, %v360_v32 }
 0x16a   : > { %v362_v34 = vrot.slane %v361_v33, 2 }
 0x16c   : > { %v363_v37 = vmax.f32 %v361_v33, %v362_v34 }
 0x16e   : > { %v364_v38 = vrot.slane %v363_v37, 1 }
 0x170   : > { %v365_v39 = vmax.f32 %v363_v37, %v364_v38 }
 0x172   : > { %vm366_vm1 = vcmp.eq.f32.partialorder %v358_v30, %v365_v39 }
 0x173   : > { %v367_v40 = vsel %vm366_vm1, %v929_v51, 8 }
 0x174   : > { %v368_v41 = vsel %vm236_vm0, %v367_v40, 2147483647 }
 0x175   : > { %v369_v42 = vrot.slane %v368_v41, 4 }
 0x177   : > { %vm370_vm2 = vcmp.lt.s32.totalorder %v368_v41, %v369_v42 }
 0x178   : > { %v371_v44 = vsel %vm370_vm2, %v368_v41, %v369_v42 }
 0x179   : > { %v372_v45 = vrot.slane %v371_v44, 2 }
 0x17b   : > { %vm373_vm3 = vcmp.lt.s32.totalorder %v371_v44, %v372_v45 }
 0x17c   : > { %v374_v46 = vsel %vm373_vm3, %v371_v44, %v372_v45 }
 0x17d   : > { %v375_v47 = vrot.slane %v374_v46, 1 }
 0x17f   : > { %vm376_vm4 = vcmp.lt.s32.totalorder %v374_v46, %v375_v47 }
 0x180   : > { %v377_v48 = vsel %vm376_vm4, %v374_v46, %v375_v47 }
 0x181   : > { %vm378_vm5 = vcmp.eq.s32.totalorder %v929_v51, %v377_v48  ;;  %v391_v51 = vsub.f32 %v390_v57, %v922_v43 }
 0x182   : > { %v379_v49 = vsel %vm378_vm5, -inf, %v358_v30 }
 0x183   : > { %v380_v50 = vsel %vm236_vm0, %v379_v49, -inf }
 0x184   : > { %v381_v52 = vrot.slane %v380_v50, 4 }
 0x186   : > { %v382_v53 = vmax.f32 %v380_v50, %v381_v52 }
 0x188   : > { %v383_v54 = vrot.slane %v382_v53, 2 }
 0x18a   : > { %v384_v55 = vmax.f32 %v382_v53, %v383_v54 }
 0x18c   : > { %v385_v56 = vrot.slane %v384_v55, 1 }
 0x18e   : > { %v386_v58 = vmax.f32 %v384_v55, %v385_v56 }
 0x190   : > { %vm387_vm6 = vcmp.gt.f32.partialorder %v922_v43, %v386_v58 }
 0x191   : > { %v557_v59 = vsel %vm387_vm6, 1.0, %v753_v0 }
 0x192   : > { %v392_v60 = vmul.f32 %v557_v59, %v391_v51 }
 0x194   : > { %397 = vperm.xlu0 %629, %v392_v60  }
 0x213   : > { %v398_v61 = vpop.permute.xlu0 %397 }
 0x214   : > { %v400_v62 = vadd.f32 %v398_v61, %v912_v35  ;;  %v401_v63 = vadd.f32 %v398_v61, %v914_v36 }
 0x216   : > { %402 = vst [vmem:[%s216_s28] sm:$0xff] %v400_v62  ;;  %403 = vst [vmem:[%s216_s28 + $0x8] sm:$0xff] %v401_v63 }
 0x217   : > { %681 = shalt.err (!%p678_p4)
}
 0x218   : > { %s682_s5 = scalar_lea.hbm %s965_s11, 256  ;;  %s686_s19 = scalar_lea.hbm %s1016_s2, 512 }
 0x219   : > { %p683_p10 = scmp.ne.s32.totalorder %s965_s11, %s682_s5  ;;  %p687_p2 = scmp.lt.u32.totalorder %s965_s11, %s1016_s2 }
 0x21a   : > { %p688_p5 = scmp.lt.u32.totalorder %s686_s19, %s682_s5  ;;  %p690_p8 = scmp.lt.u32.totalorder %s682_s5, %s965_s11 }
 0x21b   : > { %p684_p12 = pnand %p683_p10, %p1026_p11 }
 0x21c   : > { %p689_p9 = por %p688_p5, %p687_p2 }
 0x21d   : > { %p685_p1 = pneg %p684_p12 }
 0x21e   : > { %p691_p0 = por %p690_p8, %p689_p9 }
 0x220   : > { %p692_p7 = pnand %p691_p0, %p685_p1 }
 0x222   : > { %695 = shalt.err (!%p692_p7)
}
 0x223   : > { %567 = dma.vmem_to_hbm [thread:$0]  (%p1026_p11), %s967_s29, 256, %s965_s11, %s405_s15  }
 0x224 PF: > { %s438_s22 = sand.u32 1, %s730_s12   ;;  %p1027_p13 = scmp.ne.s32.totalorder %s1022_s27, 0 }
 0x225   : > { %p1028_p3 = scmp.ge.s32.totalorder %s750_s17, 2  ;;  %s439_s23 = scalar_lea.sflag [#allocation4], %s438_s22 }
 0x227   : > { %p574_p6 = pnand %p1028_p3, %p1027_p13 }
 0x229   : > { %725 = dma.done.wait (!%p574_p6), %s439_s23, 256  }
 0x22a   : > { %727 = vsyncadd (!%p574_p6), %s439_s23, 4294967040  ;;  %s20_s17 = sadd.s32 1, %s750_s17   ;;  %s1029_s12 = smov %s734_s13 }
 0x22b   : > { %p17_p4 = scmp.ge.s32.totalorder %s20_s17, 4   ;;  %s1030_s13 = smov %s738_s14 }
 0x22c   : > { %s1031_s14 = smov %s832_s26  ;;  %s1032_s15 = smov %s746_s16 }
 0x22d   : > { %s1033_s16 = smov %s1035_s20  ;;  %19 = sbr.rel (!%p17_p4) target bundleno = 6 (0x6), region = 97 }
 0x234   :  { %451 = vsyncpa [#allocation3], 1 }
 0x235   :  { %453 = vsyncpa [#allocation3 + $0x1], 1 }
 0x236   :  { %454 = vsyncpa [#allocation4], 1 }
 0x237   :  { %456 = vsyncpa [#allocation4 + $0x1], 1 }

</bundles_post_ra>
